<compile_context>
chip_gen: v7x
topology: tpu7x:2x2x1
jax: 0.10.0
libtpu: 0.0.40
codegen_flags: <defaults>
</compile_context>

<pallas_src>
import functools

import jax
import jax.numpy as jnp
from jax.experimental import pallas as pl
from jax.experimental.pallas import tpu as pltpu

_EPS = 1e-6                            # F.pairwise_distance default eps
_LANES = 128                           # TPU vreg lane width
_SUBLANES = 8                          # f32 sublane granularity
_PER_TILE_BYTES = 4 * 1024 * 1024      # per-input VMEM buffer target
_VMEM_LIMIT_BYTES = 48 * 1024 * 1024   # usage ~24 MiB -> ample headroom on all gens
_MIN_GRID_STEPS = 8                    # keep both v7x TCs busy on mid-sized N


def _cdiv(a, b):
    return (a + b - 1) // b


def _round_up(a, b):
    return _cdiv(a, b) * b


def _triplet_kernel(a_ref, p_ref, n_ref, out_ref, *, margin, n_rows, tb):
    """One batch tile (tb, D) per input -> one partial hinge sum."""
    i = pl.program_id(0)

    a = a_ref[...].astype(jnp.float32)
    p = p_ref[...].astype(jnp.float32)
    n = n_ref[...].astype(jnp.float32)

    dp = a - p + _EPS
    dn = a - n + _EPS

    pos_sq = jnp.sum(dp * dp, axis=-1, keepdims=True)       # (tb, 1)
    neg_sq = jnp.sum(dn * dn, axis=-1, keepdims=True)       # (tb, 1)

    hinge = jnp.maximum(jnp.sqrt(pos_sq) - jnp.sqrt(neg_sq) + margin, 0.0)

    # Boundary tile: rows past the real batch hold unspecified data -> mask.
    row = i * tb + jax.lax.broadcasted_iota(jnp.int32, (tb, 1), 0)
    hinge = jnp.where(row < n_rows, hinge, 0.0)

    # Per-tile partial sum, replicated over one (8, 128) output tile.
    out_ref[...] = jnp.full(out_ref.shape, jnp.sum(hinge), dtype=jnp.float32)


def triplet_loss(anchor, positive, negative, *, margin=1.0):
    """Pallas TripletLoss. anchor/positive/negative: (N, D). Returns scalar f32."""
    N, D = anchor.shape
    assert positive.shape == (N, D) and negative.shape == (N, D)

    itemsize = jnp.dtype(anchor.dtype).itemsize
    sublane = max(_SUBLANES, 32 // itemsize)        # 8 for f32, 16 for bf16
    lane_padded_d = _round_up(D, _LANES)            # VMEM lane footprint per row

    # Batch-tile size from the per-input VMEM buffer budget (lane-padded).
    tb = (_PER_TILE_BYTES // (lane_padded_d * itemsize)) // sublane * sublane
    tb = max(tb, sublane)
    # Cap so the grid keeps >= _MIN_GRID_STEPS steps (v7x megacore sharding).
    tb_cap = max(_round_up(_cdiv(N, _MIN_GRID_STEPS), sublane), sublane)
    tb = min(tb, tb_cap)

    n_tiles = _cdiv(N, tb)

    kernel = functools.partial(_triplet_kernel, margin=float(margin),
                               n_rows=N, tb=tb)
    in_spec = pl.BlockSpec((tb, D), lambda i: (i, 0))

    partials = pl.pallas_call(
        kernel,
        out_shape=jax.ShapeDtypeStruct((n_tiles, _SUBLANES, _LANES), jnp.float32),
        grid_spec=pltpu.PrefetchScalarGridSpec(
            num_scalar_prefetch=0,
            grid=(n_tiles,),
            in_specs=[in_spec, in_spec, in_spec],
            out_specs=pl.BlockSpec((1, _SUBLANES, _LANES), lambda i: (i, 0, 0)),
        ),
        compiler_params=pltpu.CompilerParams(
            dimension_semantics=("parallel",),       # no carry -> both TCs on v7x
            vmem_limit_bytes=_VMEM_LIMIT_BYTES,
        ),
    )(anchor, positive, negative)

    # Tiny final reduction over n_tiles partial sums; masked rows contributed 0.
    return jnp.sum(partials[:, 0, 0]) / N


def triplet_loss_ref(anchor, positive, negative, margin=1.0):
    """Pure-JAX reference mirroring torch.nn.functional.pairwise_distance."""
    pos = jnp.sqrt(jnp.sum((anchor - positive + _EPS) ** 2, axis=-1))
    neg = jnp.sqrt(jnp.sum((anchor - negative + _EPS) ** 2, axis=-1))
    return jnp.mean(jnp.maximum(pos - neg + margin, 0.0))


if __name__ == "__main__":
    key = jax.random.PRNGKey(0)
    k1, k2, k3 = jax.random.split(key, 3)

    # Small embedding batch; N not a multiple of the tile size so the masked
    # boundary-tile path is exercised (tb = 8 -> 2 grid steps, rows 10..15 masked).
    N, D = 10, 32
    anchor = jax.random.normal(k1, (N, D), dtype=jnp.float32)
    positive = jax.random.normal(k2, (N, D), dtype=jnp.float32)
    negative = jax.random.normal(k3, (N, D), dtype=jnp.float32)

    loss = triplet_loss(anchor, positive, negative, margin=1.0)
    loss = jax.block_until_ready(loss)

    ref = triplet_loss_ref(anchor, positive, negative, margin=1.0)
    assert jnp.allclose(loss, ref, rtol=1e-5, atol=1e-5), (loss, ref)

    print("KERNEL_OK")
</pallas_src>

<mosaic_0001>
module attributes {stable_mosaic.version = 11 : i64} {
  func.func @_triplet_kernel(%arg0: i32, %arg1: memref<8x32xf32, #tpu.memory_space<vmem>>, %arg2: memref<8x32xf32, #tpu.memory_space<vmem>>, %arg3: memref<8x32xf32, #tpu.memory_space<vmem>>, %arg4: memref<1x8x128xf32, #tpu.memory_space<vmem>>) attributes {dimension_semantics = [#tpu.dimension_semantics<parallel>], iteration_bounds = array<i64: 2>, scalar_prefetch = 0 : i64, scratch_operands = 0 : i64, tpu.core_type = #tpu.core_type<tc>, window_params = [{transform_indices = @transform_0, window_bounds = array<i64: 8, 32>}, {transform_indices = @transform_1, window_bounds = array<i64: 8, 32>}, {transform_indices = @transform_2, window_bounds = array<i64: 8, 32>}, {transform_indices = @transform_3, window_bounds = array<i64: 1, 8, 128>}]} {
    %c0 = arith.constant 0 : index
    %c0_0 = arith.constant 0 : index
    %0 = vector.load %arg1[%c0, %c0_0] : memref<8x32xf32, #tpu.memory_space<vmem>>, vector<8x32xf32>
    %c0_1 = arith.constant 0 : index
    %c0_2 = arith.constant 0 : index
    %1 = vector.load %arg2[%c0_1, %c0_2] : memref<8x32xf32, #tpu.memory_space<vmem>>, vector<8x32xf32>
    %c0_3 = arith.constant 0 : index
    %c0_4 = arith.constant 0 : index
    %2 = vector.load %arg3[%c0_3, %c0_4] : memref<8x32xf32, #tpu.memory_space<vmem>>, vector<8x32xf32>
    %3 = arith.subf %0, %1 : vector<8x32xf32>
    %cst = arith.constant 9.99999997E-7 : f32
    %4 = vector.broadcast %cst : f32 to vector<8x32xf32>
    %5 = arith.addf %3, %4 : vector<8x32xf32>
    %6 = arith.subf %0, %2 : vector<8x32xf32>
    %cst_5 = arith.constant 9.99999997E-7 : f32
    %7 = vector.broadcast %cst_5 : f32 to vector<8x32xf32>
    %8 = arith.addf %6, %7 : vector<8x32xf32>
    %9 = arith.mulf %5, %5 : vector<8x32xf32>
    %cst_6 = arith.constant dense<0.000000e+00> : vector<8xf32>
    %10 = vector.multi_reduction <add>, %9, %cst_6 [1] : vector<8x32xf32> to vector<8xf32>
    %11 = vector.shape_cast %10 : vector<8xf32> to vector<8x1xf32>
    %12 = arith.mulf %8, %8 : vector<8x32xf32>
    %cst_7 = arith.constant dense<0.000000e+00> : vector<8xf32>
    %13 = vector.multi_reduction <add>, %12, %cst_7 [1] : vector<8x32xf32> to vector<8xf32>
    %14 = vector.shape_cast %13 : vector<8xf32> to vector<8x1xf32>
    %15 = math.sqrt %11 : vector<8x1xf32>
    %16 = math.sqrt %14 : vector<8x1xf32>
    %17 = arith.subf %15, %16 : vector<8x1xf32>
    %cst_8 = arith.constant 1.000000e+00 : f32
    %18 = vector.broadcast %cst_8 : f32 to vector<8x1xf32>
    %19 = arith.addf %17, %18 : vector<8x1xf32>
    %cst_9 = arith.constant 0.000000e+00 : f32
    %20 = vector.broadcast %cst_9 : f32 to vector<8x1xf32>
    %21 = arith.maximumf %19, %20 : vector<8x1xf32>
    %c8_i32 = arith.constant 8 : i32
    %22 = arith.muli %arg0, %c8_i32 : i32
    %23 = tpu.iota {dimensions = array<i32: 0>} : vector<8x1xi32>
    %24 = vector.broadcast %22 : i32 to vector<8x1xi32>
    %25 = arith.addi %24, %23 : vector<8x1xi32>
    %c10_i32 = arith.constant 10 : i32
    %26 = vector.broadcast %c10_i32 : i32 to vector<8x1xi32>
    %27 = arith.cmpi slt, %25, %26 : vector<8x1xi32>
    %cst_10 = arith.constant 0.000000e+00 : f32
    %28 = vector.broadcast %cst_10 : f32 to vector<8x1xf32>
    %29 = arith.select %27, %21, %28 : vector<8x1xi1>, vector<8x1xf32>
    %30 = vector.shape_cast %29 : vector<8x1xf32> to vector<1x8x1xf32>
    %cst_11 = arith.constant dense<0.000000e+00> : vector<1xf32>
    %31 = vector.multi_reduction <add>, %30, %cst_11 [1, 2] : vector<1x8x1xf32> to vector<1xf32>
    %32 = vector.shape_cast %31 : vector<1xf32> to vector<1x1x1xf32>
    %33 = vector.extract %32[0, 0, 0] : f32 from vector<1x1x1xf32>
    %34 = vector.broadcast %33 : f32 to vector<1x8x128xf32>
    %c0_12 = arith.constant 0 : index
    %c0_13 = arith.constant 0 : index
    %c0_14 = arith.constant 0 : index
    %35 = vector.load %arg4[%c0_12, %c0_13, %c0_14] : memref<1x8x128xf32, #tpu.memory_space<vmem>>, vector<1x8x128xf32>
    tpu.vector_store %arg4[%c0_12, %c0_13, %c0_14], %34 {strides = array<i32>} : memref<1x8x128xf32, #tpu.memory_space<vmem>>, vector<1x8x128xf32>,
    return
  }
  func.func @transform_0(%arg0: i32) -> (i32, i32) {
    %c0_i32 = arith.constant 0 : i32
    %c0_i32_0 = arith.constant 0 : i32
    return %arg0, %c0_i32 : i32, i32
  }
  func.func @transform_1(%arg0: i32) -> (i32, i32) {
    %c0_i32 = arith.constant 0 : i32
    %c0_i32_0 = arith.constant 0 : i32
    return %arg0, %c0_i32 : i32, i32
  }
  func.func @transform_2(%arg0: i32) -> (i32, i32) {
    %c0_i32 = arith.constant 0 : i32
    %c0_i32_0 = arith.constant 0 : i32
    return %arg0, %c0_i32 : i32, i32
  }
  func.func @transform_3(%arg0: i32) -> (i32, i32, i32) {
    %c0_i32 = arith.constant 0 : i32
    %c0_i32_0 = arith.constant 0 : i32
    %c0_i32_1 = arith.constant 0 : i32
    return %arg0, %c0_i32, %c0_i32_0 : i32, i32, i32
  }
}

</mosaic_0001>

<bundles_post_ra>
// kernel: tpu_custom_call.1
= control target key start
LH: loop header
LB: loop body
LE: loop exit
PB: predicated region body
PF: predicated region fallthrough
CT: control target
= control target key end

     0   :  { %s940_s0 = inlined_call_operand.hbm [shape: f32[10,32], index: 0, kind: input, shape index: {}]   ;;  %s941_s1 = inlined_call_operand.hbm [shape: f32[10,32], index: 1, kind: input, shape index: {}]   ;;  %s942_s2 = inlined_call_operand.hbm [shape: f32[10,32], index: 2, kind: input, shape index: {}]   ;;  %s943_s3 = inlined_call_operand.hbm [shape: f32[2,8,128], index: 3, kind: output, shape index: {}]  }
   0x1   :  { %948 = sst [smem:[#allocation12_spill]] %s941_s1 }
   0x2   :  { %8 = vsyncpa [#allocation3], 0 }
   0x3   :  { %10 = vsyncpa [#allocation3 + $0x1], 0 }
   0x4   :  { %11 = vsyncpa [#allocation6], 0 }
   0x5   :  { %13 = vsyncpa [#allocation6 + $0x1], 0 }
   0x6   :  { %14 = vsyncpa [#allocation4], 0 }
   0x7   :  { %16 = vsyncpa [#allocation4 + $0x1], 0  ;;  %s704_s12 = smov 0   ;;  %s706_s13 = smov 0  }
   0x8   :  { %s708_s14 = smov 0   ;;  %s710_s15 = smov 0  }
   0x9 LB: > { %s725_s16 = sadd.s32 4294967295, %s678_s15   ;;  %s437_s17 = sadd.s32 4294967294, %s678_s15   ;;  %s678_s15 = sphi %s710_s15, %s967_s15   ;;  %s674_s14 = sphi %s708_s14, %s966_s14   ;;  %s670_s13 = sphi %s706_s13, %s965_s13   ;;  %s666_s12 = sphi %s704_s12, %s964_s12  }
   0xa   : > { %s729_s18 = sadd.s32 1, %s678_s15   ;;  %s29_s19 = sadd.s32 1, %s674_s14 }
   0xb   : > { %s26_s20 = ssub.s32 %s678_s15, %s729_s18  ;;  %p36_p0 = scmp.ne.s32.totalorder %s674_s14, %s670_s13 }
   0xc   : > { %p27_p1 = scmp.eq.s32.totalorder %s26_s20, 0  ;;  %p37_p2 = scmp.eq.s32.totalorder %s678_s15, 0 }
   0xd   : > { %p42_p3 = scmp.ne.s32.totalorder %s670_s13, %s666_s12  ;;  %p43_p4 = scmp.eq.s32.totalorder %s725_s16, 0 }
   0xe   : > { %s741_s21 = scalar_select %p27_p1, %s674_s14, %s29_s19  }
   0xf   : > { %p38_p5 = por %p37_p2, %p36_p0  ;;  %p743_p6 = por %p43_p4, %p42_p3 }
  0x10   : > { %p118_p7 = scmp.eq.s32.totalorder %s725_s16, 1  ;;  %p124_p8 = scmp.eq.s32.totalorder %s437_s17, 1 }
  0x11   : > { %s949_s22 = scalar_select %p743_p6, 1, 0 }
  0x12   : > { %p480_p10 = scmp.lt.s32.totalorder %s678_s15, 2  ;;  %p750_p11 = por %p118_p7, %p36_p0 }
  0x13   : > { %p754_p12 = por %p124_p8, %p42_p3  ;;  %s144_s25 = sand.u32 1, %s674_s14  }
  0x14   : > { %s950_s23 = scalar_select %p750_p11, 1, 0 }
  0x15   : > { %s951_s24 = scalar_select %p754_p12, 1, 0 }
  0x16   : > { %s760_s26 = sshll.u32 %s678_s15, 7  ;;  %s764_s27 = sshll.u32 %s144_s25, 3 }
  0x17   : > { %p766_p13 = pnand %p480_p10, %p38_p5  ;;  %s162_s29 = sand.u32 1, %s678_s15  }
  0x18   : > { %s953_s1 = sld [smem:[#allocation12_spill]]  ;;  %s166_s6 = scalar_lea.vmem [#allocation5], %s764_s27 }
  0x19   : > { %s952_s28 = scalar_select %p766_p13, 1, 0 }
  0x1a   : > { %s173_s7 = sshll.u32 %s166_s6, 4  ;;  %s781_s8 = scalar_lea.sflag [#allocation6], %s162_s29  ;;  %s778_s7 = int_to_ptr.vmem [resolvable:$true] %s173_s7 }
  0x1b   : > { %p787_p2 = pneg %p766_p13 }
  0x1e   : > { %s775_s5 = scalar_lea.hbm %s953_s1, %s760_s26  ;;  %s523_s19 = scalar_lea.hbm %s953_s1, 256 }
  0x1f   : > { %s518_s9 = scalar_lea.hbm %s775_s5, 128  ;;  %p524_p5 = scmp.lt.u32.totalorder %s775_s5, %s953_s1 }
  0x20   : > { %p519_p1 = scmp.ne.s32.totalorder %s775_s5, %s518_s9  ;;  %p525_p7 = scmp.lt.u32.totalorder %s523_s19, %s518_s9 }
  0x21   : > { %p527_p10 = scmp.lt.u32.totalorder %s518_s9, %s775_s5 }
  0x22   : > { %p521_p3 = pnand %p787_p2, %p519_p1  ;;  %p526_p8 = por %p525_p7, %p524_p5 }
  0x24   : > { %p522_p4 = pneg %p521_p3  ;;  %p528_p9 = por %p527_p10, %p526_p8 }
  0x26   : > { %p529_p0 = pnand %p528_p9, %p522_p4 }
  0x28   : > { %532 = shalt.err (!%p529_p0)
}
  0x29   : > { %s533_s29 = scalar_lea.vmem %s778_s7, 128  ;;  %s680_s4 = smov [#allocation5]  }
  0x2a   : > { %p534_p1 = scmp.ne.s32.totalorder %s778_s7, %s533_s29  ;;  %s538_s6 = sshll.u32 %s680_s4, 4  ;;  %s539_s6 = int_to_ptr.vmem [resolvable:$false] %s538_s6 }
  0x2b   : > { %s540_s11 = scalar_lea.vmem %s539_s6, 256  ;;  %p541_p11 = scmp.lt.s32.totalorder %s778_s7, %s539_s6 }
  0x2c   : > { %p536_p3 = pnand %p534_p1, %p787_p2  ;;  %p542_p6 = scmp.lt.s32.totalorder %s540_s11, %s533_s29 }
  0x2e   : > { %p537_p12 = pneg %p536_p3  ;;  %p543_p5 = por %p542_p6, %p541_p11 }
  0x30   : > { %p544_p7 = pnand %p543_p5, %p537_p12 }
  0x32   : > { %547 = shalt.err (!%p544_p7)
}
  0x33   : > { %472 = dma.hbm_to_vmem [thread:$0]  (!%p766_p13), %s775_s5, 128, %s778_s7, %s781_s8  }
  0x34   : > { %p196_p9 = scmp.lt.s32.totalorder %s678_s15, 3  ;;  %s816_s19 = scalar_lea.hbm %s940_s0, %s760_s26 }
  0x35   : > { %p955_p6 = scmp.ge.s32.totalorder %s678_s15, 1  ;;  %s148_s30 = scalar_lea.vmem [#allocation2], %s764_s27 }
  0x36   : > { %s155_s29 = sshll.u32 %s148_s30, 4  ;;  %s145_s5 = scalar_lea.sflag [#allocation3], %s144_s25  ;;  %s156_s29 = int_to_ptr.vmem [resolvable:$true] %s155_s29 }
  0x37   : > { %p820_p11 = pnand %p955_p6, %p196_p9  ;;  %s548_s7 = scalar_lea.hbm %s816_s19, 128 }
  0x38   : > { %p549_p12 = scmp.ne.s32.totalorder %s816_s19, %s548_s7  ;;  %s553_s11 = scalar_lea.hbm %s940_s0, 256 }
  0x39   : > { %s956_s20 = scalar_select %p820_p11, 1, 0 }
  0x3a   : > { %p551_p0 = pnand %p549_p12, %p787_p2  ;;  %p554_p8 = scmp.lt.u32.totalorder %s816_s19, %s940_s0 }
  0x3b   : > { %p555_p10 = scmp.lt.u32.totalorder %s553_s11, %s548_s7  ;;  %p557_p3 = scmp.lt.u32.totalorder %s548_s7, %s816_s19 }
  0x3c   : > { %p552_p4 = pneg %p551_p0 }
  0x3d   : > { %p556_p1 = por %p555_p10, %p554_p8 }
  0x3f   : > { %p558_p5 = por %p557_p3, %p556_p1 }
  0x41   : > { %p559_p7 = pnand %p558_p5, %p552_p4 }
  0x43   : > { %562 = shalt.err (!%p559_p7)
}
  0x44   : > { %s563_s25 = scalar_lea.vmem %s156_s29, 128  ;;  %s681_s30 = smov [#allocation2]  }
  0x45   : > { %p564_p9 = scmp.ne.s32.totalorder %s156_s29, %s563_s25  ;;  %s568_s1 = sshll.u32 %s681_s30, 4  ;;  %s569_s1 = int_to_ptr.vmem [resolvable:$false] %s568_s1 }
  0x46   : > { %s570_s4 = scalar_lea.vmem %s569_s1, 256  ;;  %p571_p0 = scmp.lt.s32.totalorder %s156_s29, %s569_s1 }
  0x47   : > { %p566_p6 = pnand %p564_p9, %p787_p2  ;;  %p572_p11 = scmp.lt.s32.totalorder %s570_s4, %s563_s25 }
  0x49   : > { %p567_p12 = pneg %p566_p6  ;;  %p573_p13 = por %p572_p11, %p571_p0 }
  0x4b   : > { %p574_p8 = pnand %p573_p13, %p567_p12 }
  0x4d   : > { %577 = shalt.err (!%p574_p8)
}
  0x4e   : > { %p957_p10 = scmp.ne.s32.totalorder %s952_s28, 0  ;;  %s848_s11 = scalar_lea.hbm %s942_s2, %s760_s26 }
  0x4f   : > { %s184_s1 = scalar_lea.vmem [#allocation7], %s764_s27  ;;  %s578_s17 = scalar_lea.hbm %s848_s11, 128 }
  0x50   : > { %469 = dma.hbm_to_vmem [thread:$0]  (!%p957_p10), %s816_s19, 128, %s156_s29, %s145_s5  }
  0x51   : > { %s191_s9 = sshll.u32 %s184_s1, 4  ;;  %p579_p13 = scmp.ne.s32.totalorder %s848_s11, %s578_s17  ;;  %s192_s9 = int_to_ptr.vmem [resolvable:$true] %s191_s9 }
  0x52   : > { %s583_s19 = scalar_lea.hbm %s942_s2, 256  ;;  %p584_p1 = scmp.lt.u32.totalorder %s848_s11, %s942_s2 }
  0x53   : > { %p581_p11 = pnand %p579_p13, %p787_p2  ;;  %p585_p3 = scmp.lt.u32.totalorder %s583_s19, %s578_s17 }
  0x54   : > { %p587_p7 = scmp.lt.u32.totalorder %s578_s17, %s848_s11 }
  0x55   : > { %p582_p4 = pneg %p581_p11  ;;  %p586_p5 = por %p585_p3, %p584_p1 }
  0x57   : > { %p588_p9 = por %p587_p7, %p586_p5 }
  0x59   : > { %p589_p6 = pnand %p588_p9, %p582_p4 }
  0x5b   : > { %592 = shalt.err (!%p589_p6)
}
  0x5c   : > { %s593_s26 = scalar_lea.vmem %s192_s9, 128  ;;  %s682_s27 = smov [#allocation7]  }
  0x5d   : > { %p594_p12 = scmp.ne.s32.totalorder %s192_s9, %s593_s26  ;;  %s598_s4 = sshll.u32 %s682_s27, 4  ;;  %s599_s4 = int_to_ptr.vmem [resolvable:$false] %s598_s4 }
  0x5e   : > { %s600_s7 = scalar_lea.vmem %s599_s4, 256  ;;  %p601_p13 = scmp.lt.s32.totalorder %s192_s9, %s599_s4 }
  0x5f   : > { %p596_p0 = pnand %p594_p12, %p787_p2  ;;  %p602_p11 = scmp.lt.s32.totalorder %s600_s7, %s593_s26 }
  0x61   : > { %p597_p8 = pneg %p596_p0  ;;  %p603_p10 = por %p602_p11, %p601_p13 }
  0x63   : > { %p604_p1 = pnand %p603_p10, %p597_p8 }
  0x65   : > { %607 = shalt.err (!%p604_p1)
}
  0x66   : > { %p958_p3 = scmp.ne.s32.totalorder %s952_s28, 0  ;;  %p959_p4 = scmp.ne.s32.totalorder %s956_s20, 0 }
  0x67   : > { %s872_s10 = sand.u32 (!%p959_p4), 1, %s670_s13   ;;  %p960_p2 = scmp.ne.s32.totalorder (!%p959_p4), %s949_s22, 0 }
  0x68   : > { %475 = dma.hbm_to_vmem [thread:$0]  (!%p958_p3), %s848_s11, 128, %s192_s9, %s781_s8  }
  0x69   : > { %200 = sbr.rel (%p959_p4) target bundleno = 512 (0x200), region = 32  ;;  %s875_s6 = sshll.u32 (!%p959_p4), %s872_s10, 3 }
  0x6a   : > { %s203_s1 = scalar_lea.sflag (!%p959_p4), [#allocation3], %s872_s10  ;;  %s206_s17 = scalar_lea.vmem (!%p959_p4), [#allocation2], %s875_s6 }
  0x70   : > { %653 = dma.done.wait (%p960_p2), %s203_s1, 128  }
  0x71   : > { %655 = vsyncadd (%p960_p2), %s203_s1, 4294967168  ;;  %s211_s28 = sand.u32 1, %s725_s16   ;;  %s215_s20 = scalar_lea.vmem [#allocation5], %s875_s6 }
  0x72   : > { %s212_s8 = scalar_lea.sflag [#allocation6], %s211_s28 }
  0x73   : > { %657 = dma.done.wait (%p960_p2), %s212_s8, 256  }
  0x74   : > { %659 = vsyncadd (%p960_p2), %s212_s8, 4294967040  ;;  %v257_v0 = vld [vmem:[%s206_s17] sm:$0xff]  ;;  %v258_v1 = vld [vmem:[%s215_s20] sm:$0xff]  ;;  %s224_s11 = scalar_lea.vmem [#allocation7], %s875_s6  ;;  %vm265_vm0 = vcmask 261120   ;;  %v291_v14 = vlaneseq  ;;  %s451_s22 = sshll.u32 %s725_s16, 3 }
  0x75   : > { %v259_v2 = vld [vmem:[%s224_s11] sm:$0xff]  ;;  %v260_v3 = vsub.f32 %v257_v0, %v258_v1  ;;  %v293_v20 = vstv %s451_s22  ;;  %vm297_vm6 = vcmask 7168   ;;  %s256_s9 = scalar_lea.vmem [#allocation8], %s875_s6  ;;  %s453_s30 = sshll.u32 %s725_s16, 7 }
  0x76   : > { %v262_v4 = vsub.f32 %v257_v0, %v259_v2  ;;  %v292_v17 = vshrl.u32 %v291_v14, 7  ;;  %s324_s25 = sshll.u32 %s256_s9, 4  ;;  %s898_s26 = scalar_lea.hbm %s943_s3, %s453_s30  ;;  %s893_s25 = int_to_ptr.vmem [resolvable:$true] %s324_s25 }
  0x77   : > { %v261_v5 = vadd.f32 1e-06, %v260_v3  ;;  %s311_s27 = scalar_lea.sflag [#allocation4], %s872_s10  ;;  %s608_s4 = scalar_lea.vmem %s893_s25, 128 }
  0x78   : > { %v263_v6 = vadd.f32 1e-06, %v262_v4  ;;  %v294_v26 = vadd.s32 %v293_v20, %v292_v17  ;;  %p609_p10 = scmp.ne.s32.totalorder %s893_s25, %s608_s4  ;;  %p961_p5 = scmp.ne.s32.totalorder %s950_s23, 0 }
  0x79   : > { %v264_v7 = vmul.f32 %v261_v5, %v261_v5  ;;  %s683_s16 = smov [#allocation8]  }
  0x7a   : > { %v269_v8 = vmul.f32 %v263_v6, %v263_v6  ;;  %vm295_vm5 = vcmp.lt.s32.totalorder %v294_v26, 10  ;;  %p610_p7 = pnand %p609_p10, %p961_p5  ;;  %s612_s7 = sshll.u32 %s683_s16, 4  ;;  %s613_s7 = int_to_ptr.vmem [resolvable:$false] %s612_s7 }
  0x7b   : > { %v266_v9 = vsel %vm265_vm0, %v264_v7, 0.0  ;;  %s614_s6 = scalar_lea.vmem %s613_s7, 256  ;;  %p615_p6 = scmp.lt.s32.totalorder %s893_s25, %s613_s7 }
  0x7c   : > { %267 = vadd.xlane.f32.xlu0 %v266_v9  ;;  %v270_v10 = vsel %vm265_vm0, %v269_v8, 0.0  ;;  %p611_p9 = pneg %p610_p7  ;;  %p616_p12 = scmp.lt.s32.totalorder %s614_s6, %s608_s4 }
  0x7e   : > { %p617_p0 = por %p616_p12, %p615_p6 }
  0x80   : > { %271 = vadd.xlane.f32.xlu0 %v270_v10  ;;  %p618_p8 = pnand %p617_p0, %p611_p9 }
 0x109   : > { %v268_v11 = vpop.xlane.xlu0 %267 }
 0x10a   : > { %514 = vrsqrt.f32 %v268_v11  ;;  %vm275_vm1 = vcmp.eq.f32.partialorder %v268_v11, inf  ;;  %v278_v22 = vand.u32 2147483648, %v268_v11  ;;  %vm277_vm3 = vcmp.eq.f32.partialorder %v268_v11, 0.0 }
 0x10d   : > { %v272_v12 = vpop.xlane.xlu0 %271 }
 0x10e   : > { %516 = vrsqrt.f32 %v272_v12  ;;  %vm282_vm2 = vcmp.eq.f32.partialorder %v272_v12, inf  ;;  %v285_v21 = vand.u32 2147483648, %v272_v12  ;;  %vm284_vm4 = vcmp.eq.f32.partialorder %v272_v12, 0.0 }
 0x114   : > { %v515_v13 = vpop.eup %514 }
 0x115   : > { %v274_v15 = vmul.f32 %v515_v13, %v268_v11 }
 0x117   : > { %v276_v19 = vsel %vm275_vm1, %v268_v11, %v274_v15 }
 0x118   : > { %v517_v16 = vpop.eup %516  ;;  %v279_v24 = vsel %vm277_vm3, %v278_v22, %v276_v19 }
 0x119   : > { %v281_v18 = vmul.f32 %v517_v16, %v272_v12 }
 0x11b   : > { %v283_v23 = vsel %vm282_vm2, %v272_v12, %v281_v18 }
 0x11c   : > { %v286_v25 = vsel %vm284_vm4, %v285_v21, %v283_v23 }
 0x11d   : > { %v287_v27 = vsub.f32 %v279_v24, %v286_v25 }
 0x11f   : > { %v288_v28 = vadd.f32 1.0, %v287_v27 }
 0x121   : > { %v289_v29 = vmax.f32 %v288_v28, 0.0 }
 0x123   : > { %v296_v30 = vsel %vm295_vm5, %v289_v29, 0.0 }
 0x124   : > { %v298_v31 = vsel %vm297_vm6, %v296_v30, 0.0 }
 0x125   : > { %299 = vadd.xlane.f32.xlu1 %v298_v31 }
 0x1b2   : > { %v300_v32 = vpop.xlane.xlu1 %299 }
 0x1b3   : > { %v301_v33 = vrot.slane %v300_v32, 4 }
 0x1b5   : > { %v302_v34 = vadd.f32 %v301_v33, %v300_v32 }
 0x1b7   : > { %v303_v35 = vrot.slane %v302_v34, 2 }
 0x1b9   : > { %v304_v36 = vadd.f32 %v303_v35, %v302_v34 }
 0x1bb   : > { %v305_v37 = vrot.slane %v304_v36, 1 }
 0x1bd   : > { %v306_v38 = vadd.f32 %v305_v37, %v304_v36 }
 0x1bf   : > { %456 = vpush %v306_v38 }
 0x1f0   : > { %s457_s19 = spop %456 }
 0x1f1   : > { %v308_v39 = vstv %s457_s19 }
 0x1f2   : > { %309 = vst [vmem:[%s256_s9] sm:$0xff] %v308_v39 }
 0x1f3   : > { %621 = shalt.err (!%p618_p8)
}
 0x1f4   : > { %s622_s10 = scalar_lea.hbm %s898_s26, 128  ;;  %s626_s28 = scalar_lea.hbm %s943_s3, 256 }
 0x1f5   : > { %p623_p13 = scmp.ne.s32.totalorder %s898_s26, %s622_s10  ;;  %p627_p3 = scmp.lt.u32.totalorder %s898_s26, %s943_s3 }
 0x1f6   : > { %p628_p4 = scmp.lt.u32.totalorder %s626_s28, %s622_s10  ;;  %p630_p10 = scmp.lt.u32.totalorder %s622_s10, %s898_s26 }
 0x1f7   : > { %p624_p11 = pnand %p623_p13, %p961_p5 }
 0x1f8   : > { %p629_p2 = por %p628_p4, %p627_p3 }
 0x1f9   : > { %p625_p1 = pneg %p624_p11 }
 0x1fa   : > { %p631_p7 = por %p630_p10, %p629_p2 }
 0x1fc   : > { %p632_p9 = pnand %p631_p7, %p625_p1 }
 0x1fe   : > { %635 = shalt.err (!%p632_p9)
}
 0x1ff   : > { %464 = dma.vmem_to_hbm [thread:$0]  (%p961_p5), %s893_s25, 128, %s898_s26, %s311_s27  }
 0x200 PF: > { %s336_s11 = sand.u32 1, %s666_s12   ;;  %p962_p6 = scmp.ne.s32.totalorder %s951_s24, 0 }
 0x201   : > { %p963_p12 = scmp.ge.s32.totalorder %s678_s15, 2  ;;  %s337_s22 = scalar_lea.sflag [#allocation4], %s336_s11 }
 0x203   : > { %p477_p0 = pnand %p963_p12, %p962_p6 }
 0x205   : > { %661 = dma.done.wait (!%p477_p0), %s337_s22, 128  }
 0x206   : > { %663 = vsyncadd (!%p477_p0), %s337_s22, 4294967168  ;;  %p19_p8 = scmp.ge.s32.totalorder %s729_s18, 4   ;;  %s964_s12 = smov %s670_s13 }
 0x207   : > { %s965_s13 = smov %s674_s14  ;;  %s966_s14 = smov %s741_s21 }
 0x208   : > { %s967_s15 = smov %s729_s18  ;;  %21 = sbr.rel (!%p19_p8) target bundleno = 9 (0x9), region = 101 }
 0x20f   :  { %342 = vsyncpa [#allocation3], 1 }
 0x210   :  { %344 = vsyncpa [#allocation3 + $0x1], 1 }
 0x211   :  { %345 = vsyncpa [#allocation6], 1 }
 0x212   :  { %347 = vsyncpa [#allocation6 + $0x1], 1 }
 0x213   :  { %348 = vsyncpa [#allocation4], 1 }
 0x214   :  { %350 = vsyncpa [#allocation4 + $0x1], 1 }

</bundles_post_ra>
